<compile_context>
chip_gen: v7x
topology: tpu7x:2x2x1
jax: 0.10.0
libtpu: 0.0.40
codegen_flags: <defaults>
</compile_context>

<pallas_src>
import jax
import jax.numpy as jnp
from jax.experimental import pallas as pl
from jax.experimental.pallas import tpu as pltpu


def _mlp_kernel(x_ref, p1_ref, p2_ref, out_ref):
    # x_ref  : [TB, n_input]              (pipelined batch tile)
    # p1_ref : [n_input + 1, n_hidden]    (rows 0..n_input-1 = W1, last row = b1)
    # p2_ref : [n_hidden + 1, n_outcome]  (rows 0..n_hidden-1 = W2, last row = b2)
    x = x_ref[...]
    p1 = p1_ref[...]
    p2 = p2_ref[...]

    h = jnp.dot(x, p1[:-1, :], preferred_element_type=jnp.float32) + p1[-1:, :]
    h = jnp.maximum(h, 0.0)                                           # ReLU
    o = jnp.dot(h, p2[:-1, :], preferred_element_type=jnp.float32) + p2[-1:, :]
    out_ref[...] = o.astype(out_ref.dtype)


def nn_scp_forward(x, w1, b1, w2, b2, *, tb=1024):
    """Pallas implementation of NN_SCP.forward (binary_outcome=False)."""
    B, n_input = x.shape
    n_hidden = w1.shape[1]
    n_outcome = w2.shape[1]

    # Pack (W, b) pairs so the resident parameters arrive in 2 DMAs instead of 4.
    p1 = jnp.concatenate([w1, b1.reshape(1, n_hidden)], axis=0)      # [n_input+1, H]
    p2 = jnp.concatenate([w2, b2.reshape(1, n_outcome)], axis=0)     # [H+1, n_outcome]

    # Batch tile: large enough to amortize the ~0.35 us/step grid overhead; a
    # multiple of 8 (sublane) whenever it does not cover the whole batch.
    tb = min(tb, B)
    if tb < B:
        tb = max(8, (tb // 8) * 8)
    grid = (pl.cdiv(B, tb),)

    itemsize = jnp.dtype(x.dtype).itemsize
    cost = pl.CostEstimate(
        flops=2 * B * (n_input * n_hidden + n_hidden * n_outcome),
        transcendentals=0,
        bytes_accessed=(B * (n_input + n_outcome) + p1.size + p2.size) * itemsize,
    )

    outcome = pl.pallas_call(
        _mlp_kernel,
        out_shape=jax.ShapeDtypeStruct((B, n_outcome), x.dtype),
        grid_spec=pl.GridSpec(
            grid=grid,
            in_specs=[
                pl.BlockSpec((tb, n_input), lambda i: (i, 0)),   # x: pipelined
                pl.BlockSpec(p1.shape, lambda i: (0, 0)),        # params: resident
                pl.BlockSpec(p2.shape, lambda i: (0, 0)),
            ],
            out_specs=pl.BlockSpec((tb, n_outcome), lambda i: (i, 0)),
        ),
        compiler_params=pltpu.CompilerParams(
            dimension_semantics=("parallel",),                   # megacore on v7x
        ),
        cost_estimate=cost,
    )(x, p1, p2)

    # Match the PyTorch module's return signature: (outcome, 0, 0, 0)
    return outcome, 0, 0, 0


def init_params(key, n_input, n_hidden, n_outcome, dtype=jnp.float32):
    """Parameter init mirroring nn.Linear shapes.

    PyTorch nn.Linear stores weight as [out, in]; we store the transpose
    ([in, out]) so the kernel computes x @ W (identical math).
    """
    k1, k2, k3, k4 = jax.random.split(key, 4)
    bound1 = 1.0 / jnp.sqrt(n_input)
    bound2 = 1.0 / jnp.sqrt(n_hidden)
    w1 = jax.random.uniform(k1, (n_input, n_hidden), dtype, -bound1, bound1)
    b1 = jax.random.uniform(k2, (1, n_hidden), dtype, -bound1, bound1)
    w2 = jax.random.uniform(k3, (n_hidden, n_outcome), dtype, -bound2, bound2)
    b2 = jax.random.uniform(k4, (1, n_outcome), dtype, -bound2, bound2)
    return w1, b1, w2, b2


if __name__ == "__main__":
    # Module hyper-params (small, consistent with __init__):
    #   n_confounder=4, n_cause=4  -> n_input = 8
    #   n_confounder_rep=8, n_outcome_rep=7 -> hidden = 8 + 7 + 1 = 16
    #   n_outcome=4, binary_outcome=False
    n_confounder, n_cause = 4, 4
    n_confounder_rep, n_outcome_rep = 8, 7
    n_outcome = 4
    n_input = n_confounder + n_cause
    n_hidden = n_confounder_rep + n_outcome_rep + 1
    batch = 128

    key = jax.random.PRNGKey(0)
    kx, kp = jax.random.split(key)
    x = jax.random.normal(kx, (batch, n_input), jnp.float32)
    w1, b1, w2, b2 = init_params(kp, n_input, n_hidden, n_outcome)

    # Reference in plain JAX (same math as the PyTorch module).
    ref = jnp.maximum(x @ w1 + b1, 0.0) @ w2 + b2

    # (1) Small tile -> multi-step grid path (exercises batch tiling / pipelining).
    outcome, z0, z1, z2 = nn_scp_forward(x, w1, b1, w2, b2, tb=64)
    jax.block_until_ready(outcome)
    assert outcome.shape == (batch, n_outcome)
    assert jnp.allclose(outcome, ref, atol=1e-5, rtol=1e-5)
    assert (z0, z1, z2) == (0, 0, 0)

    # (2) Default tile (clamped to the full small batch) -> single-step path.
    outcome2, _, _, _ = nn_scp_forward(x, w1, b1, w2, b2)
    jax.block_until_ready(outcome2)
    assert jnp.allclose(outcome2, ref, atol=1e-5, rtol=1e-5)

    print("KERNEL_OK")
</pallas_src>

<mosaic_0001>
module attributes {stable_mosaic.version = 11 : i64} {
  func.func @_mlp_kernel(%arg0: i32, %arg1: memref<64x8xf32, #tpu.memory_space<vmem>>, %arg2: memref<9x16xf32, #tpu.memory_space<vmem>>, %arg3: memref<17x4xf32, #tpu.memory_space<vmem>>, %arg4: memref<64x4xf32, #tpu.memory_space<vmem>>) attributes {dimension_semantics = [#tpu.dimension_semantics<parallel>], iteration_bounds = array<i64: 2>, scalar_prefetch = 0 : i64, scratch_operands = 0 : i64, tpu.core_type = #tpu.core_type<tc>, window_params = [{transform_indices = @transform_0, window_bounds = array<i64: 64, 8>}, {pipeline_mode = #tpu.pipeline_mode<synchronous>, transform_indices = @transform_1, window_bounds = array<i64: 9, 16>}, {pipeline_mode = #tpu.pipeline_mode<synchronous>, transform_indices = @transform_2, window_bounds = array<i64: 17, 4>}, {transform_indices = @transform_3, window_bounds = array<i64: 64, 4>}]} {
    %c0 = arith.constant 0 : index
    %c0_0 = arith.constant 0 : index
    %0 = vector.load %arg1[%c0, %c0_0] : memref<64x8xf32, #tpu.memory_space<vmem>>, vector<64x8xf32>
    %c0_1 = arith.constant 0 : index
    %c0_2 = arith.constant 0 : index
    %1 = vector.load %arg2[%c0_1, %c0_2] : memref<9x16xf32, #tpu.memory_space<vmem>>, vector<9x16xf32>
    %c0_3 = arith.constant 0 : index
    %c0_4 = arith.constant 0 : index
    %2 = vector.load %arg3[%c0_3, %c0_4] : memref<17x4xf32, #tpu.memory_space<vmem>>, vector<17x4xf32>
    %3 = vector.extract_strided_slice %1 {offsets = [0, 0], sizes = [8, 16], strides = [1, 1]} : vector<9x16xf32> to vector<8x16xf32>
    %cst = arith.constant dense<0.000000e+00> : vector<64x16xf32>
    %4 = tpu.matmul %0, %3, %cst {dimension_numbers = #tpu.dot_dimension_numbers<[1], [0], [0], [1], [0, 0, 1, 1], [], []>} : vector<64x8xf32>, vector<8x16xf32>, vector<64x16xf32> -> vector<64x16xf32>
    %5 = vector.extract_strided_slice %1 {offsets = [8, 0], sizes = [1, 16], strides = [1, 1]} : vector<9x16xf32> to vector<1x16xf32>
    %6 = vector.broadcast %5 : vector<1x16xf32> to vector<64x16xf32>
    %7 = arith.addf %4, %6 : vector<64x16xf32>
    %cst_5 = arith.constant 0.000000e+00 : f32
    %8 = vector.broadcast %cst_5 : f32 to vector<64x16xf32>
    %9 = arith.maximumf %7, %8 : vector<64x16xf32>
    %10 = vector.extract_strided_slice %2 {offsets = [0, 0], sizes = [16, 4], strides = [1, 1]} : vector<17x4xf32> to vector<16x4xf32>
    %cst_6 = arith.constant dense<0.000000e+00> : vector<64x4xf32>
    %11 = tpu.matmul %9, %10, %cst_6 {dimension_numbers = #tpu.dot_dimension_numbers<[1], [0], [0], [1], [0, 0, 1, 1], [], []>} : vector<64x16xf32>, vector<16x4xf32>, vector<64x4xf32> -> vector<64x4xf32>
    %12 = vector.extract_strided_slice %2 {offsets = [16, 0], sizes = [1, 4], strides = [1, 1]} : vector<17x4xf32> to vector<1x4xf32>
    %13 = vector.broadcast %12 : vector<1x4xf32> to vector<64x4xf32>
    %14 = arith.addf %11, %13 : vector<64x4xf32>
    %c0_7 = arith.constant 0 : index
    %c0_8 = arith.constant 0 : index
    %15 = vector.load %arg4[%c0_7, %c0_8] : memref<64x4xf32, #tpu.memory_space<vmem>>, vector<64x4xf32>
    tpu.vector_store %arg4[%c0_7, %c0_8], %14 {strides = array<i32>} : memref<64x4xf32, #tpu.memory_space<vmem>>, vector<64x4xf32>,
    return
  }
  func.func @transform_0(%arg0: i32) -> (i32, i32) {
    %c0_i32 = arith.constant 0 : i32
    %c0_i32_0 = arith.constant 0 : i32
    return %arg0, %c0_i32 : i32, i32
  }
  func.func @transform_1(%arg0: i32) -> (i32, i32) {
    %c0_i32 = arith.constant 0 : i32
    %c0_i32_0 = arith.constant 0 : i32
    %c0_i32_1 = arith.constant 0 : i32
    return %c0_i32, %c0_i32_0 : i32, i32
  }
  func.func @transform_2(%arg0: i32) -> (i32, i32) {
    %c0_i32 = arith.constant 0 : i32
    %c0_i32_0 = arith.constant 0 : i32
    %c0_i32_1 = arith.constant 0 : i32
    return %c0_i32, %c0_i32_0 : i32, i32
  }
  func.func @transform_3(%arg0: i32) -> (i32, i32) {
    %c0_i32 = arith.constant 0 : i32
    %c0_i32_0 = arith.constant 0 : i32
    return %arg0, %c0_i32 : i32, i32
  }
}

</mosaic_0001>

<bundles_post_ra>
// kernel: tpu_custom_call.1
= control target key start
LH: loop header
LB: loop body
LE: loop exit
PB: predicated region body
PF: predicated region fallthrough
CT: control target
= control target key end

     0   :  { %s646_s12 = smov 0   ;;  %s709_s0 = inlined_call_operand.vmem [shape: f32[128,8], index: 0, kind: input, shape index: {}]   ;;  %s710_s1 = inlined_call_operand.vmem [shape: f32[9,16], index: 1, kind: input, shape index: {}]   ;;  %s711_s2 = inlined_call_operand.vmem [shape: f32[17,4], index: 2, kind: input, shape index: {}]   ;;  %s712_s3 = inlined_call_operand.vmem [shape: f32[128,4], index: 3, kind: output, shape index: {}]  }
   0x1 LB: > { %s528_s13 = sadd.s32 4294967295, %s624_s12   ;;  %p532_p0 = scmp.ge.s32.totalorder %s624_s12, 1  ;;  %s624_s12 = sphi %s646_s12, %s13_s12  }
   0x2   : > { %p138_p1 = scmp.lt.s32.totalorder %s624_s12, 3 }
   0x4   : > { %p139_p2 = pnand %p532_p0, %p138_p1 }
   0x5   : > { %v182_v0 = vld [vmem:[%s710_s1] sm:$0xff] (!%p139_p2)  ;;  %s533_s16 = sshll.u32 (!%p139_p2), %s528_s13, 3  ;;  %vm191_vm0 = vcmask (!%p139_p2), 64512   ;;  %v185_v10 = vld [vmem:[%s711_s2 + $0x8] sm:$0xff] (!%p139_p2)  ;;  %vm333_vm1 = vcmask (!%p139_p2), 130048   ;;  %vm463_vm2 = vcmask (!%p139_p2), 31744  }
   0x6   : > { %142 = sbr.rel (%p139_p2) target bundleno = 464 (0x1d0), region = 32  ;;  %576 = vmatprep.subr.mxu0 (!%p139_p2), %v182_v0  ;;  %p163_p3 = scmp.lt.s32.totalorder (!%p139_p2), %s533_s16, 15  ;;  %v184_v9 = vld [vmem:[%s711_s2] sm:$0xff] (!%p139_p2)  ;;  %v537_v12 = vld [vmem:[%s710_s1 + $0x8] ss:$0 sm:$0xff] (!%p139_p2) }
   0x7   : > { %577 = vmatpush3.msra.mxu0 (!%p139_p2), %v182_v0  ;;  %v606_v11 = vpack.c.bf16 (!%p139_p2), %v185_v10, %v184_v9  ;;  %v546_v37 = vld [vmem:[%s711_s2 + $0x10] ss:$0 sm:$0xff] (!%p139_p2) }
   0x9   : > { %607 = vmatprep.subr.bf16.mxu1 (!%p139_p2), %v606_v11 }
   0xa   : > { %609 = vmatpush3.bf16.msra.mxu1 (!%p139_p2), %v606_v11 }
   0xd   : > { %s714_s16 = smov (!%p163_p3, %s533_s16), 15 }
   0xe   : > { %s534_s17 = sshll.u32 %s714_s16, 3 }
   0xf   : > { %s166_s20 = scalar_lea.vmem %s709_s0, %s534_s17  ;;  %s172_s4 = scalar_lea.vmem %s712_s3, %s534_s17 }
  0x10   : > { %v174_v1 = vld [vmem:[%s166_s20] sm:$0xff]  ;;  %v175_v2 = vld [vmem:[%s166_s20 + $0x8] sm:$0xff]  ;;  %v176_v3 = vld [vmem:[%s166_s20 + $0x10] sm:$0xff] }
  0x11   : > { %578 = vmatprep.mubr.msk.f32.mxu0 %vm191_vm0, %v174_v1  ;;  %v177_v4 = vld [vmem:[%s166_s20 + $0x18] sm:$0xff]  ;;  %v178_v5 = vld [vmem:[%s166_s20 + $0x20] sm:$0xff]  ;;  %v179_v6 = vld [vmem:[%s166_s20 + $0x28] sm:$0xff] }
  0x12   : > { %579 = vmatmul.mubr.msk.f32.vlgmr.msra.gmra.mrb[0].mxu0 %vm191_vm0, %v175_v2  ;;  %v180_v7 = vld [vmem:[%s166_s20 + $0x30] sm:$0xff]  ;;  %v181_v8 = vld [vmem:[%s166_s20 + $0x38] sm:$0xff] }
  0x13   : > { %581 = vmatprep.mubr.msk.f32.mxu0 %vm191_vm0, %v176_v3 }
  0x16   : > { %582 = vmatmul.mubr.msk.f32.gmra.mrb[2].mxu0 %vm191_vm0, %v177_v4 }
  0x17   : > { %584 = vmatprep.mubr.msk.f32.mxu0 %vm191_vm0, %v178_v5 }
  0x1a   : > { %585 = vmatmul.mubr.msk.f32.gmra.mrb[4].mxu0 %vm191_vm0, %v179_v6 }
  0x1b   : > { %587 = vmatprep.mubr.msk.f32.mxu0 %vm191_vm0, %v180_v7 }
  0x1e   : > { %588 = vmatmul.mubr.msk.f32.gmra.mrb[6].mxu0 %vm191_vm0, %v181_v8 }
  0xe5   : > { %v580_v13 = vpop.f32.mrb[0].mxu0 }
  0xe6   : > { %v288_v14 = vadd.f32 %v580_v13, %v537_v12  ;;  %v282_v15 = vpop.f32.mrb[1].mxu0 }
  0xe7   : > { %v283_v16 = vadd.f32 %v537_v12, %v282_v15 }
  0xe8   : > { %v322_v19 = vmax.f32 %v288_v14, 0.0 }
  0xe9   : > { %v321_v17 = vmax.f32 %v283_v16, 0.0  ;;  %v583_v18 = vpop.f32.mrb[2].mxu0 }
  0xea   : > { %v298_v20 = vadd.f32 %v583_v18, %v537_v12  ;;  %v292_v21 = vpop.f32.mrb[3].mxu0 }
  0xeb   : > { %v293_v22 = vadd.f32 %v537_v12, %v292_v21  ;;  %594 = vmatprep.mubr.msk.f32.mxu1 %vm333_vm1, %v321_v17 }
  0xec   : > { %595 = vmatmul.mubr.msk.f32.vlgmr.msra.gmra.mrb[0].mxu1 %vm333_vm1, %v322_v19  ;;  %v324_v25 = vmax.f32 %v298_v20, 0.0 }
  0xed   : > { %v323_v23 = vmax.f32 %v293_v22, 0.0  ;;  %v586_v24 = vpop.f32.mrb[4].mxu0 }
  0xee   : > { %v308_v26 = vadd.f32 %v586_v24, %v537_v12  ;;  %v302_v27 = vpop.f32.mrb[5].mxu0 }
  0xef   : > { %v303_v28 = vadd.f32 %v537_v12, %v302_v27  ;;  %597 = vmatprep.mubr.msk.f32.mxu1 %vm333_vm1, %v323_v23 }
  0xf0   : > { %598 = vmatmul.mubr.msk.f32.gmra.mrb[2].mxu1 %vm333_vm1, %v324_v25  ;;  %v326_v31 = vmax.f32 %v308_v26, 0.0 }
  0xf1   : > { %v325_v29 = vmax.f32 %v303_v28, 0.0  ;;  %v589_v30 = vpop.f32.mrb[6].mxu0 }
  0xf2   : > { %v318_v32 = vadd.f32 %v589_v30, %v537_v12  ;;  %v312_v33 = vpop.f32.mrb[7].mxu0 }
  0xf3   : > { %v313_v34 = vadd.f32 %v537_v12, %v312_v33  ;;  %600 = vmatprep.mubr.msk.f32.mxu1 %vm333_vm1, %v325_v29 }
  0xf4   : > { %601 = vmatmul.mubr.msk.f32.gmra.mrb[4].mxu1 %vm333_vm1, %v326_v31  ;;  %v328_v36 = vmax.f32 %v318_v32, 0.0 }
  0xf5   : > { %v327_v35 = vmax.f32 %v313_v34, 0.0 }
  0xf7   : > { %603 = vmatprep.mubr.msk.f32.mxu1 %vm333_vm1, %v327_v35 }
  0xf8   : > { %604 = vmatmul.mubr.msk.f32.gmra.mrb[6].mxu1 %vm333_vm1, %v328_v36 }
 0x1bf   : > { %v596_v38 = vpop.f32.mrb[0].mxu1 }
 0x1c0   : > { %v430_v39 = vadd.f32 %v596_v38, %v546_v37  ;;  %v424_v40 = vpop.f32.mrb[1].mxu1 }
 0x1c1   : > { %v425_v41 = vadd.f32 %v546_v37, %v424_v40 }
 0x1c2   : > { %465 = vst.msk [vmem:[%s172_s4 + $0x8] sm:$0xff] %vm463_vm2, %v430_v39 }
 0x1c3   : > { %464 = vst.msk [vmem:[%s172_s4] sm:$0xff] %vm463_vm2, %v425_v41  ;;  %v599_v42 = vpop.f32.mrb[2].mxu1 }
 0x1c4   : > { %v440_v43 = vadd.f32 %v599_v42, %v546_v37  ;;  %v434_v44 = vpop.f32.mrb[3].mxu1 }
 0x1c5   : > { %v435_v45 = vadd.f32 %v546_v37, %v434_v44 }
 0x1c6   : > { %467 = vst.msk [vmem:[%s172_s4 + $0x18] sm:$0xff] %vm463_vm2, %v440_v43 }
 0x1c7   : > { %466 = vst.msk [vmem:[%s172_s4 + $0x10] sm:$0xff] %vm463_vm2, %v435_v45  ;;  %v602_v46 = vpop.f32.mrb[4].mxu1 }
 0x1c8   : > { %v450_v47 = vadd.f32 %v602_v46, %v546_v37  ;;  %v444_v48 = vpop.f32.mrb[5].mxu1 }
 0x1c9   : > { %v445_v49 = vadd.f32 %v546_v37, %v444_v48 }
 0x1ca   : > { %469 = vst.msk [vmem:[%s172_s4 + $0x28] sm:$0xff] %vm463_vm2, %v450_v47 }
 0x1cb   : > { %468 = vst.msk [vmem:[%s172_s4 + $0x20] sm:$0xff] %vm463_vm2, %v445_v49  ;;  %v605_v50 = vpop.f32.mrb[6].mxu1 }
 0x1cc   : > { %v460_v51 = vadd.f32 %v605_v50, %v546_v37  ;;  %v454_v52 = vpop.f32.mrb[7].mxu1 }
 0x1cd   : > { %v455_v53 = vadd.f32 %v546_v37, %v454_v52 }
 0x1ce   : > { %471 = vst.msk [vmem:[%s172_s4 + $0x38] sm:$0xff] %vm463_vm2, %v460_v51 }
 0x1cf   : > { %470 = vst.msk [vmem:[%s172_s4 + $0x30] sm:$0xff] %vm463_vm2, %v455_v53 }
 0x1d0 PF: > { %s13_s12 = sadd.s32 1, %s624_s12  }
 0x1d1   : > { %p10_p4 = scmp.ge.s32.totalorder %s13_s12, 4  }
 0x1d3   :  { %12 = sbr.rel (!%p10_p4) target bundleno = 1 (0x1), region = 62 }

</bundles_post_ra>
